<compile_context>
chip_gen: v7x
topology: tpu7x:2x2x1
jax: 0.10.0
libtpu: 0.0.40
codegen_flags: <defaults>
</compile_context>

<pallas_src>
import jax
import jax.numpy as jnp
from jax.experimental import pallas as pl
from jax.experimental.pallas import tpu as pltpu

_EPS = 1e-12  # torch.nn.functional.normalize default
_LANE = 128


def _round_up(x, m):
    return (x + m - 1) // m * m


def _round_down(x, m):
    return x // m * m


def _vmem_capacity_bytes():
    try:
        return int(pltpu.get_tpu_info().vmem_capacity_bytes)
    except Exception:
        return 64 * 1024 * 1024  # conservative fallback: v7x per-TC VMEM


def _l2norm_kernel(x_ref, w_ref, o_ref):
    # Works for both layouts:
    #   3D: x_ref (b, C, s_tile),       w_ref (1, C, 1)
    #   4D: x_ref (b, C, s1_tile, 128), w_ref (1, C, 1, 1)
    # Channel axis is always axis=1.
    x = x_ref[...].astype(jnp.float32)
    ss = jnp.sum(x * x, axis=1, keepdims=True)   # reduce over channels
    ss = jnp.maximum(ss, _EPS * _EPS)            # clamp_min(norm, eps) == max(ss, eps^2)
    inv = jax.lax.rsqrt(ss)                      # EUP rsqrt instead of sqrt + divide
    o_ref[...] = (x * inv * w_ref[...]).astype(o_ref.dtype)


def l2norm_forward(x_nchw, weight):
    """x_nchw: (N, C, H, W); weight: (C,). Returns (N, C, H, W)."""
    N, C, H, W = x_nchw.shape
    S = H * W
    dtype = x_nchw.dtype
    itemsize = jnp.dtype(dtype).itemsize
    sub_pack = 8 * (4 // itemsize)               # sublane packing: 8 f32 / 16 bf16 / 32 int8

    # --- VMEM budgeting (generation-aware; conservative for v7x's 64 MiB) ---
    cap = _vmem_capacity_bytes()
    vmem_limit = min(max(cap - 16 * 1024 * 1024, 32 * 1024 * 1024), 96 * 1024 * 1024)
    # Footprint per padded block element: in+out blocks, double buffered, in the
    # input dtype, plus f32 compute temporaries for the block.
    per_elem_bytes = 4 * itemsize + 2 * 4
    budget_bytes = min(40 * 1024 * 1024, vmem_limit - 8 * 1024 * 1024)
    max_block_elems = budget_bytes // per_elem_bytes

    use_4d = (C < sub_pack) and (S % _LANE == 0)

    if use_4d:
        # Spatial on both sublane and lane axes -> full (8,128) occupancy.
        S1 = S // _LANE
        x_in = x_nchw.reshape(N, C, S1, _LANE)
        w_in = weight.astype(jnp.float32).reshape(1, C, 1, 1)

        elems_per_s1 = C * _LANE                          # per image, per unit of S1
        max_s1 = max(1, max_block_elems // elems_per_s1)
        if S1 <= max_s1:
            s1_tile = S1                                   # full extent: always legal
        else:
            s1_tile = max(sub_pack, _round_down(max_s1, sub_pack))
        grid_s = pl.cdiv(S1, s1_tile)

        # v7x: keep >= 2 programs when the whole image fits in one block.
        if N == 1 and grid_s == 1 and S1 >= 2 * sub_pack:
            s1_tile = _round_up(-(-S1 // 2), sub_pack)
            grid_s = pl.cdiv(S1, s1_tile)

        b_tile = 1
        if grid_s == 1 and N > 1:
            per_image = C * _round_up(S1, sub_pack) * _LANE
            max_b = max(1, max_block_elems // per_image)
            max_b = min(max_b, max(1, N // 2))             # keep >= 2 programs (dual-TC)
            for cand in range(max_b, 0, -1):
                if N % cand == 0:
                    b_tile = cand
                    break

        block = (b_tile, C, s1_tile, _LANE)
        x_spec = pl.BlockSpec(block, lambda b, s: (b, 0, s, 0))
        w_spec = pl.BlockSpec((1, C, 1, 1), lambda b, s: (0, 0, 0, 0))
        out_shape = jax.ShapeDtypeStruct((N, C, S1, _LANE), dtype)
        block_bytes = b_tile * C * _round_up(s1_tile, sub_pack) * _LANE * itemsize
    else:
        # Channels on sublanes (fully packed for C >= sub_pack), lane-dense spatial.
        x_in = x_nchw.reshape(N, C, S)
        w_in = weight.astype(jnp.float32).reshape(1, C, 1)

        C_pad = _round_up(C, sub_pack)
        max_s = max(1, max_block_elems // C_pad)
        if S <= max_s:
            s_tile = S                                     # full extent: always legal
        else:
            s_tile = max(_LANE, _round_down(max_s, _LANE))
        grid_s = pl.cdiv(S, s_tile)

        if N == 1 and grid_s == 1 and S >= 2 * _LANE:
            s_tile = _round_up(-(-S // 2), _LANE)
            grid_s = pl.cdiv(S, s_tile)

        b_tile = 1
        if grid_s == 1 and N > 1:
            per_image = C_pad * _round_up(S, _LANE)
            max_b = max(1, max_block_elems // per_image)
            max_b = min(max_b, max(1, N // 2))
            for cand in range(max_b, 0, -1):
                if N % cand == 0:
                    b_tile = cand
                    break

        block = (b_tile, C, s_tile)
        x_spec = pl.BlockSpec(block, lambda b, s: (b, 0, s))
        w_spec = pl.BlockSpec((1, C, 1), lambda b, s: (0, 0, 0))
        out_shape = jax.ShapeDtypeStruct((N, C, S), dtype)
        block_bytes = b_tile * C_pad * _round_up(s_tile, _LANE) * itemsize

    # Sanity: 2x double-buffered (in + out) blocks + f32 temporaries + weight must fit.
    footprint = 4 * block_bytes + 2 * (block_bytes // itemsize) * 4 + C * 4
    assert footprint <= vmem_limit, (footprint, vmem_limit)

    grid = (N // b_tile, grid_s)

    out = pl.pallas_call(
        _l2norm_kernel,
        out_shape=out_shape,
        grid_spec=pltpu.PrefetchScalarGridSpec(
            num_scalar_prefetch=0,
            grid=grid,
            in_specs=[x_spec, w_spec],
            out_specs=x_spec,
        ),
        compiler_params=pltpu.CompilerParams(
            dimension_semantics=("parallel", "parallel"),
            vmem_limit_bytes=vmem_limit,
        ),
    )(x_in, w_in)

    return out.reshape(N, C, H, W)


def _reference(x, weight):
    norm = jnp.maximum(jnp.sqrt(jnp.sum(x * x, axis=1, keepdims=True)), _EPS)
    return weight[None, :, None, None] * (x / norm)


if __name__ == "__main__":
    key = jax.random.PRNGKey(0)
    k1, k2, k3 = jax.random.split(key, 3)

    # Small shapes consistent with the module: batch=2, channels=4, spatial=16.
    N, C, H, W = 2, 4, 16, 16
    scale = 20.0  # SSD uses L2Norm(512, 20); weight initialized to the constant scale.

    x = jax.random.normal(k1, (N, C, H, W), dtype=jnp.float32)
    weight = jnp.full((C,), scale, dtype=jnp.float32)

    out = jax.block_until_ready(l2norm_forward(x, weight))    # exercises the 4D (small-C) path
    ref = _reference(x, weight)
    assert out.shape == (N, C, H, W)
    assert jnp.allclose(out, ref, atol=1e-5, rtol=1e-5), "mismatch vs reference (4D path)"

    # Secondary tiny check exercising the 3D (channels-on-sublane) path.
    x2 = jax.random.normal(k2, (2, 8, 6, 6), dtype=jnp.float32)
    w2 = jax.random.normal(k3, (8,), dtype=jnp.float32)
    out2 = jax.block_until_ready(l2norm_forward(x2, w2))
    ref2 = _reference(x2, w2)
    assert jnp.allclose(out2, ref2, atol=1e-5, rtol=1e-5), "mismatch vs reference (3D path)"

    print("KERNEL_OK")
</pallas_src>

<mosaic_0001>
module attributes {stable_mosaic.version = 11 : i64} {
  func.func @_l2norm_kernel(%arg0: i32, %arg1: i32, %arg2: memref<1x4x2x128xf32, #tpu.memory_space<vmem>>, %arg3: memref<1x4x1x1xf32, #tpu.memory_space<vmem>>, %arg4: memref<1x4x2x128xf32, #tpu.memory_space<vmem>>) attributes {dimension_semantics = [#tpu.dimension_semantics<parallel>, #tpu.dimension_semantics<parallel>], iteration_bounds = array<i64: 2, 1>, scalar_prefetch = 0 : i64, scratch_operands = 0 : i64, tpu.core_type = #tpu.core_type<tc>, window_params = [{transform_indices = @transform_0, window_bounds = array<i64: 1, 4, 2, 128>}, {pipeline_mode = #tpu.pipeline_mode<synchronous>, transform_indices = @transform_1, window_bounds = array<i64: 1, 4, 1, 1>}, {transform_indices = @transform_2, window_bounds = array<i64: 1, 4, 2, 128>}]} {
    %c0 = arith.constant 0 : index
    %c0_0 = arith.constant 0 : index
    %c0_1 = arith.constant 0 : index
    %c0_2 = arith.constant 0 : index
    %0 = vector.load %arg2[%c0, %c0_0, %c0_1, %c0_2] : memref<1x4x2x128xf32, #tpu.memory_space<vmem>>, vector<1x4x2x128xf32>
    %1 = arith.mulf %0, %0 : vector<1x4x2x128xf32>
    %cst = arith.constant dense<0.000000e+00> : vector<1x2x128xf32>
    %2 = vector.multi_reduction <add>, %1, %cst [1] : vector<1x4x2x128xf32> to vector<1x2x128xf32>
    %3 = vector.shape_cast %2 : vector<1x2x128xf32> to vector<1x1x2x128xf32>
    %cst_3 = arith.constant 1.000000e-24 : f32
    %4 = vector.broadcast %cst_3 : f32 to vector<1x1x2x128xf32>
    %5 = arith.maximumf %3, %4 : vector<1x1x2x128xf32>
    %6 = math.rsqrt %5 : vector<1x1x2x128xf32>
    %7 = vector.broadcast %6 : vector<1x1x2x128xf32> to vector<1x4x2x128xf32>
    %8 = arith.mulf %0, %7 : vector<1x4x2x128xf32>
    %c0_4 = arith.constant 0 : index
    %c0_5 = arith.constant 0 : index
    %c0_6 = arith.constant 0 : index
    %c0_7 = arith.constant 0 : index
    %9 = vector.load %arg3[%c0_4, %c0_5, %c0_6, %c0_7] : memref<1x4x1x1xf32, #tpu.memory_space<vmem>>, vector<1x4x1x1xf32>
    %10 = vector.broadcast %9 : vector<1x4x1x1xf32> to vector<1x4x2x128xf32>
    %11 = arith.mulf %8, %10 : vector<1x4x2x128xf32>
    %c0_8 = arith.constant 0 : index
    %c0_9 = arith.constant 0 : index
    %c0_10 = arith.constant 0 : index
    %c0_11 = arith.constant 0 : index
    %12 = vector.load %arg4[%c0_8, %c0_9, %c0_10, %c0_11] : memref<1x4x2x128xf32, #tpu.memory_space<vmem>>, vector<1x4x2x128xf32>
    tpu.vector_store %arg4[%c0_8, %c0_9, %c0_10, %c0_11], %11 {strides = array<i32>} : memref<1x4x2x128xf32, #tpu.memory_space<vmem>>, vector<1x4x2x128xf32>,
    return
  }
  func.func @transform_0(%arg0: i32, %arg1: i32) -> (i32, i32, i32, i32) {
    %c0_i32 = arith.constant 0 : i32
    %c0_i32_0 = arith.constant 0 : i32
    %c0_i32_1 = arith.constant 0 : i32
    return %arg0, %c0_i32, %arg1, %c0_i32_0 : i32, i32, i32, i32
  }
  func.func @transform_1(%arg0: i32, %arg1: i32) -> (i32, i32, i32, i32) {
    %c0_i32 = arith.constant 0 : i32
    %c0_i32_0 = arith.constant 0 : i32
    %c0_i32_1 = arith.constant 0 : i32
    %c0_i32_2 = arith.constant 0 : i32
    %c0_i32_3 = arith.constant 0 : i32
    return %c0_i32, %c0_i32_0, %c0_i32_1, %c0_i32_2 : i32, i32, i32, i32
  }
  func.func @transform_2(%arg0: i32, %arg1: i32) -> (i32, i32, i32, i32) {
    %c0_i32 = arith.constant 0 : i32
    %c0_i32_0 = arith.constant 0 : i32
    %c0_i32_1 = arith.constant 0 : i32
    return %arg0, %c0_i32, %arg1, %c0_i32_0 : i32, i32, i32, i32
  }
}

</mosaic_0001>

<bundles_post_ra>
// kernel: tpu_custom_call.1
= control target key start
LH: loop header
LB: loop body
LE: loop exit
PB: predicated region body
PF: predicated region fallthrough
CT: control target
= control target key end

     0   :  { %7 = vsyncpa [#allocation3], 0  ;;  %s768_s0 = inlined_call_operand.hbm [shape: f32[2,4,2,128], index: 0, kind: input, shape index: {}]   ;;  %s769_s1 = inlined_call_operand.vmem [shape: f32[1,4,1,1], index: 1, kind: input, shape index: {}]   ;;  %s770_s2 = inlined_call_operand.hbm [shape: f32[2,4,2,128], index: 2, kind: output, shape index: {}]  }
   0x1   :  { %9 = vsyncpa [#allocation3 + $0x1], 0 }
   0x2   :  { %10 = vsyncpa [#allocation4], 0 }
   0x3   :  { %12 = vsyncpa [#allocation4 + $0x1], 0  ;;  %s577_s9 = smov 0   ;;  %s579_s10 = smov 0  }
   0x4   :  { %s581_s11 = smov 0   ;;  %s583_s12 = smov 0  }
   0x5   :  { %s585_s13 = smov 0   ;;  %s587_s14 = smov 0  }
   0x6 LB: > { %s349_s15 = sadd.s32 4294967295, %s553_s14   ;;  %s350_s16 = sadd.s32 4294967294, %s553_s14   ;;  %s553_s14 = sphi %s587_s14, %s18_s14   ;;  %s549_s13 = sphi %s585_s13, %s785_s13   ;;  %s545_s12 = sphi %s583_s12, %s784_s12   ;;  %s541_s11 = sphi %s581_s11, %s783_s11   ;;  %s537_s10 = sphi %s579_s10, %s782_s10   ;;  %s533_s9 = sphi %s577_s9, %s781_s9  }
   0x7   : > { %s30_s17 = sadd.s32 1, %s549_s13  ;;  %s39_s18 = sadd.s32 1, %s541_s11 }
   0x8   : > { %p32_p0 = scmp.ge.s32.totalorder %s30_s17, 2  ;;  %p46_p1 = scmp.ne.s32.totalorder %s541_s11, %s537_s10 }
   0x9   : > { %p47_p2 = scmp.eq.s32.totalorder %s553_s14, 0  ;;  %p52_p3 = scmp.ne.s32.totalorder %s537_s10, %s533_s9 }
   0xa   : > { %s787_s17 = smov (%p32_p0, %s30_s17), 0  ;;  %p53_p5 = scmp.eq.s32.totalorder %s349_s15, 0 }
   0xb   : > { %p618_p4 = por %p47_p2, %p46_p1  ;;  %s34_s20 = ssub.s32 %s549_s13, %s787_s17 }
   0xc   : > { %p99_p6 = scmp.eq.s32.totalorder %s349_s15, 1  ;;  %p37_p7 = scmp.eq.s32.totalorder %s34_s20, 0 }
   0xd   : > { %p624_p8 = por %p53_p5, %p52_p3  ;;  %p105_p10 = scmp.eq.s32.totalorder %s350_s16, 1 }
   0xe   : > { %p628_p9 = por %p99_p6, %p46_p1  ;;  %p382_p13 = scmp.lt.s32.totalorder %s553_s14, 2 }
   0xf   : > { %s633_s23 = scalar_select %p37_p7, %s541_s11, %s39_s18  }
  0x10   : > { %s774_s22 = scalar_select %p628_p9, 1, 0 }
  0x11   : > { %p635_p11 = por %p105_p10, %p52_p3  ;;  %s128_s25 = sand.u32 1, %s541_s11  }
  0x12   : > { %s353_s26 = sshll.u32 %s128_s25, 3  ;;  %s368_s27 = sshll.u32 %s549_s13, 7 }
  0x13   : > { %s775_s24 = scalar_select %p635_p11, 1, 0 }
  0x14   : > { %s646_s30 = scalar_lea.hbm %s768_s0, %s368_s27  ;;  %s132_s3 = scalar_lea.vmem [#allocation2], %s353_s26 }
  0x15   : > { %s140_s4 = sshll.u32 %s132_s3, 4  ;;  %p652_p0 = pnand %p382_p13, %p618_p4  ;;  %s648_s4 = int_to_ptr.vmem [resolvable:$true] %s140_s4 }
  0x16   : > { %s657_s6 = scalar_lea.sflag [#allocation3], %s128_s25  ;;  %s441_s7 = scalar_lea.hbm %s646_s30, 128 }
  0x17   : > { %p442_p2 = scmp.ne.s32.totalorder %s646_s30, %s441_s7  ;;  %p443_p3 = pneg %p652_p0 }
  0x18   : > { %s446_s16 = scalar_lea.hbm %s768_s0, 256  ;;  %p447_p4 = scmp.lt.u32.totalorder %s646_s30, %s768_s0 }
  0x19   : > { %p444_p5 = pnand %p443_p3, %p442_p2  ;;  %p448_p7 = scmp.lt.u32.totalorder %s446_s16, %s441_s7 }
  0x1a   : > { %p450_p13 = scmp.lt.u32.totalorder %s441_s7, %s646_s30 }
  0x1b   : > { %p445_p6 = pneg %p444_p5  ;;  %p449_p10 = por %p448_p7, %p447_p4 }
  0x1d   : > { %p451_p12 = por %p450_p13, %p449_p10 }
  0x1f   : > { %p452_p1 = pnand %p451_p12, %p445_p6 }
  0x21   : > { %455 = shalt.err (!%p452_p1)
}
  0x22   : > { %s456_s20 = scalar_lea.vmem %s648_s4, 128  ;;  %s555_s25 = smov [#allocation2]  }
  0x23   : > { %p457_p2 = scmp.ne.s32.totalorder %s648_s4, %s456_s20  ;;  %s461_s26 = sshll.u32 %s555_s25, 4  ;;  %s462_s26 = int_to_ptr.vmem [resolvable:$false] %s461_s26 }
  0x24   : > { %s463_s27 = scalar_lea.vmem %s462_s26, 256  ;;  %p464_p9 = scmp.lt.s32.totalorder %s648_s4, %s462_s26 }
  0x25   : > { %p459_p5 = pnand %p457_p2, %p443_p3  ;;  %p465_p4 = scmp.lt.s32.totalorder %s463_s27, %s456_s20 }
  0x27   : > { %p460_p11 = pneg %p459_p5  ;;  %p466_p7 = por %p465_p4, %p464_p9 }
  0x29   : > { %p467_p10 = pnand %p466_p7, %p460_p11 }
  0x2b   : > { %470 = shalt.err (!%p467_p10)
}
  0x2c   : > { %s556_s28 = smov 32   ;;  %s557_s29 = smov 2  }
  0x2d   : > { %377 = dma.hbm_to_vmem [thread:$0]  (!%p652_p0), %s646_s30, 128, %s648_s4, %s657_s6, %s556_s28, %s556_s28, %s557_s29  }
  0x2e   : > { %p148_p12 = scmp.lt.s32.totalorder %s553_s14, 3  ;;  %p777_p1 = scmp.ge.s32.totalorder %s553_s14, 1 }
  0x30   : > { %p149_p3 = pnand %p777_p1, %p148_p12 }
  0x31   : > { %s689_s3 = sand.u32 (!%p149_p3), 1, %s537_s10  }
  0x32   : > { %152 = sbr.rel (%p149_p3) target bundleno = 209 (0xd1), region = 28  ;;  %s357_s7 = sshll.u32 (!%p149_p3), %s689_s3, 3 }
  0x33   : > { %s155_s8 = scalar_lea.sflag (!%p149_p3), [#allocation3], %s689_s3  ;;  %s158_s15 = scalar_lea.vmem (!%p149_p3), [#allocation2], %s357_s7 }
  0x39   : > { %524 = dma.done.wait (%p624_p8), %s155_s8, 128  }
  0x3a   : > { %526 = vsyncadd (%p624_p8), %s155_s8, 4294967168  ;;  %v558_v0 = vmov 0   ;;  %v361_v1 = vld [vmem:[%s769_s1 + $0x2] ss:$0 sm:$0xff]  ;;  %v359_v2 = vld [vmem:[%s769_s1] ss:$0 sm:$0xff] }
  0x3b   : > { %438 = vset.pattern.permute.xlu1 %v558_v0  ;;  %437 = vset.pattern.permute.xlu0 %v558_v0  ;;  %v362_v3 = vld [vmem:[%s769_s1 + $0x3] ss:$0 sm:$0xff]  ;;  %v360_v4 = vld [vmem:[%s769_s1 + $0x1] ss:$0 sm:$0xff]  ;;  %vm187_vm0 = vcmask 1041408   ;;  %s178_s20 = scalar_lea.vmem [#allocation5], %s357_s7 }
  0x3c   : > { %234 = vperm.xlu1 %438, %v361_v1   ;;  %226 = vperm.xlu0 %437, %v359_v2   ;;  %v179_v5 = vld [vmem:[%s158_s15] sm:$0x3]  ;;  %v180_v6 = vld [vmem:[%s158_s15 + $0x2] sm:$0x3]  ;;  %v181_v9 = vld [vmem:[%s158_s15 + $0x4] sm:$0x3] }
  0x3d   : > { %v183_v7 = vmul.f32 %v179_v5, %v179_v5  ;;  %v184_v8 = vmul.f32 %v180_v6, %v180_v6  ;;  %v185_v10 = vmul.f32 %v181_v9, %v181_v9  ;;  %v182_v13 = vld [vmem:[%s158_s15 + $0x6] sm:$0x3]  ;;  %s264_s25 = sshll.u32 %s178_s20, 4  ;;  %s369_s26 = sshll.u32 %s545_s12, 7  ;;  %s714_s25 = int_to_ptr.vmem [resolvable:$true] %s264_s25 }
  0x3e   : > { %v186_v15 = vmul.f32 %v182_v13, %v182_v13  ;;  %s719_s29 = scalar_lea.hbm %s770_s2, %s369_s26  ;;  %s250_s7 = scalar_lea.sflag [#allocation4], %s689_s3 }
  0x3f   : > { %v188_v11 = vsel %vm187_vm0, %v183_v7, 0.0  ;;  %v189_v12 = vsel %vm187_vm0, %v184_v8, 0.0  ;;  %v191_v16 = vsel %vm187_vm0, %v185_v10, 0.0  ;;  %s471_s12 = scalar_lea.vmem %s714_s25, 128  ;;  %p778_p9 = scmp.ne.s32.totalorder %s774_s22, 0 }
  0x40   : > { %238 = vperm.xlu1 %438, %v362_v3   ;;  %230 = vperm.xlu0 %437, %v360_v4   ;;  %v190_v14 = vadd.f32 %v189_v12, %v188_v11  ;;  %v193_v18 = vsel %vm187_vm0, %v186_v15, 0.0  ;;  %p472_p8 = scmp.ne.s32.totalorder %s714_s25, %s471_s12  ;;  %s559_s8 = smov [#allocation5]  }
  0x41   : > { %s475_s15 = sshll.u32 %s559_s8, 4  ;;  %s476_s15 = int_to_ptr.vmem [resolvable:$false] %s475_s15 }
  0x42   : > { %v192_v17 = vadd.f32 %v191_v16, %v190_v14  ;;  %p473_p11 = pnand %p472_p8, %p778_p9  ;;  %s477_s30 = scalar_lea.vmem %s476_s15, 256 }
  0x43   : > { %p478_p6 = scmp.lt.s32.totalorder %s714_s25, %s476_s15  ;;  %p479_p13 = scmp.lt.s32.totalorder %s477_s30, %s471_s12 }
  0x44   : > { %v194_v19 = vadd.f32 %v193_v18, %v192_v17  ;;  %p474_p0 = pneg %p473_p11 }
  0x45   : > { %p480_p2 = por %p479_p13, %p478_p6 }
  0x46   : > { %v195_v20 = vmax.f32 %v194_v19, 1e-24 }
  0x47   : > { %p481_p5 = pnand %p480_p2, %p474_p0 }
  0x48   : > { %439 = vrsqrt.f32 %v195_v20 }
  0x52   : > { %v440_v21 = vpop.eup %439 }
  0x53   : > { %v199_v22 = vmul.f32 %v440_v21, %v181_v9  ;;  %v197_v23 = vmul.f32 %v440_v21, %v179_v5  ;;  %v200_v28 = vmul.f32 %v440_v21, %v182_v13  ;;  %v198_v29 = vmul.f32 %v440_v21, %v180_v6 }
  0xbb   : > { %v235_v24 = vpop.permute.xlu1 %234  ;;  %v227_v25 = vpop.permute.xlu0 %226 }
  0xbc   : > { %v243_v26 = vmul.f32 %v235_v24, %v199_v22  ;;  %v241_v27 = vmul.f32 %v227_v25, %v197_v23 }
  0xbe   : > { %247 = vst [vmem:[%s178_s20 + $0x4] sm:$0x3] %v243_v26  ;;  %245 = vst [vmem:[%s178_s20] sm:$0x3] %v241_v27 }
  0xbf   : > { %v239_v30 = vpop.permute.xlu1 %238  ;;  %v231_v31 = vpop.permute.xlu0 %230 }
  0xc0   : > { %v244_v32 = vmul.f32 %v239_v30, %v200_v28  ;;  %v242_v33 = vmul.f32 %v231_v31, %v198_v29 }
  0xc2   : > { %248 = vst [vmem:[%s178_s20 + $0x6] sm:$0x3] %v244_v32  ;;  %246 = vst [vmem:[%s178_s20 + $0x2] sm:$0x3] %v242_v33 }
  0xc3   : > { %484 = shalt.err (!%p481_p5)
}
  0xc4   : > { %s485_s4 = scalar_lea.hbm %s719_s29, 128  ;;  %s489_s16 = scalar_lea.hbm %s770_s2, 256 }
  0xc5   : > { %p486_p4 = scmp.ne.s32.totalorder %s719_s29, %s485_s4  ;;  %p490_p12 = scmp.lt.u32.totalorder %s719_s29, %s770_s2 }
  0xc6   : > { %p491_p1 = scmp.lt.u32.totalorder %s489_s16, %s485_s4  ;;  %p493_p8 = scmp.lt.u32.totalorder %s485_s4, %s719_s29 }
  0xc7   : > { %p487_p7 = pnand %p486_p4, %p778_p9 }
  0xc8   : > { %p492_p3 = por %p491_p1, %p490_p12 }
  0xc9   : > { %p488_p10 = pneg %p487_p7 }
  0xca   : > { %p494_p11 = por %p493_p8, %p492_p3 }
  0xcc   : > { %p495_p0 = pnand %p494_p11, %p488_p10 }
  0xce   : > { %498 = shalt.err (!%p495_p0)
}
  0xcf   : > { %s560_s21 = smov 32   ;;  %s561_s20 = smov 2  }
  0xd0   : > { %372 = dma.vmem_to_hbm [thread:$0]  (%p778_p9), %s714_s25, 128, %s719_s29, %s250_s7, %s560_s21, %s560_s21, %s561_s20  }
  0xd1 PF: > { %s279_s26 = sand.u32 1, %s533_s9   ;;  %p779_p6 = scmp.ne.s32.totalorder %s775_s24, 0 }
  0xd2   : > { %p780_p13 = scmp.ge.s32.totalorder %s553_s14, 2  ;;  %s280_s27 = scalar_lea.sflag [#allocation4], %s279_s26 }
  0xd4   : > { %p379_p2 = pnand %p780_p13, %p779_p6 }
  0xd6   : > { %528 = dma.done.wait (!%p379_p2), %s280_s27, 128  }
  0xd7   : > { %530 = vsyncadd (!%p379_p2), %s280_s27, 4294967168  ;;  %s18_s14 = sadd.s32 1, %s553_s14   ;;  %s781_s9 = smov %s537_s10 }
  0xd8   : > { %p15_p5 = scmp.ge.s32.totalorder %s18_s14, 4   ;;  %s782_s10 = smov %s541_s11 }
  0xd9   : > { %s783_s11 = smov %s633_s23  ;;  %s784_s12 = smov %s549_s13 }
  0xda   : > { %s785_s13 = smov %s787_s17  ;;  %17 = sbr.rel (!%p15_p5) target bundleno = 6 (0x6), region = 73 }
  0xe1   :  { %285 = vsyncpa [#allocation3], 1 }
  0xe2   :  { %287 = vsyncpa [#allocation3 + $0x1], 1 }
  0xe3   :  { %288 = vsyncpa [#allocation4], 1 }
  0xe4   :  { %290 = vsyncpa [#allocation4 + $0x1], 1 }

</bundles_post_ra>
